<compile_context>
chip_gen: v5e
topology: v5e:2x2
jax: 0.10.0
libtpu: 0.0.40
codegen_flags: <defaults>
</compile_context>

<pallas_src>
import math

import jax
import jax.numpy as jnp
from jax import lax
from jax.experimental import pallas as pl
from jax.experimental.pallas import tpu as pltpu


# ---------------------------------------------------------------------------
# VMEM accounting helpers
# ---------------------------------------------------------------------------

def _vmem_capacity_bytes():
    try:
        return int(pltpu.get_tpu_info().vmem_capacity_bytes)
    except Exception:
        return 128 << 20   # v5e/v6e default if the query is unavailable


def _vmem_block_bytes(shape, dtype):
    """Padded VMEM footprint of a block: rows pad to the sublane tile
    (8 for 32-bit, 16 for 16-bit), lanes pad to 128."""
    itemsize = jnp.dtype(dtype).itemsize
    sub = {4: 8, 2: 16, 1: 32}.get(itemsize, 8)
    shape = tuple(int(d) for d in shape)
    if len(shape) == 1:
        shape = (1,) + shape
    lead = 1
    for d in shape[:-2]:
        lead *= d
    r = -(-shape[-2] // sub) * sub
    c = -(-shape[-1] // 128) * 128
    return lead * r * c * itemsize


def _select_tiles(n, vmem_need_fn, budget, sub):
    """Pick (tile_n, tile_k) minimizing grid steps (then maximizing DMA size)
    under the padded-VMEM budget.  tile_k < n must be a multiple of 128 (lane
    dim of the adj block); tile_n < n must be a multiple of `sub`."""
    tk_cands = [n] + [k for k in (4096, 2048, 1024, 512, 256, 128) if k < n]
    tn_cands = [n] + [t for t in (2048, 1024, 512, 256, 128, 64, 32, 16, 8)
                      if t < n and t % sub == 0]
    best = None
    for tk in tk_cands:
        for tn in tn_cands:
            need = vmem_need_fn(tn, tk)
            if need > budget:
                continue
            rows, ksteps = pl.cdiv(n, tn), pl.cdiv(n, tk)
            if n > 256 and rows < 2:
                continue            # each v7x TensorCore gets >= 1 row tile
            if n > 512 and rows * ksteps < 4:
                continue            # >= 2 pipelined steps per core
            # fewest steps, then an even row count (balances the 2 TCs),
            # then the biggest adj tile (largest DMAs).
            key = (rows * ksteps, rows % 2, -(tn * tk), need)
            if best is None or key < best[1]:
                best = ((tn, tk, need), key)
    if best is None:   # degenerate fallback: smallest legal tiles always fit
        tn, tk = min(n, sub), min(n, 128)
        return tn, tk, vmem_need_fn(tn, tk)
    return best[0]


# ---------------------------------------------------------------------------
# Kernels
# ---------------------------------------------------------------------------

def _make_adj_s_kernel(has_bias, n_total, tile_k, mask_k):
    """K-tiled: acc += adj[i, k] @ S[k]; at last k: out = acc (+ bias)."""

    def kernel(adj_ref, s_ref, *rest):
        if has_bias:
            bias_ref, out_ref, acc_ref = rest
        else:
            out_ref, acc_ref = rest
            bias_ref = None
        k = pl.program_id(1)

        @pl.when(k == 0)
        def _():
            acc_ref[...] = jnp.zeros_like(acc_ref)

        adj_blk = adj_ref[...]
        s_blk = s_ref[...]
        if mask_k:
            # Partial last K tile: OOB reads are undefined; zero BOTH operands
            # (0 * garbage-NaN would still be NaN).
            k_left = n_total - k * tile_k
            col = lax.broadcasted_iota(jnp.int32, adj_blk.shape, 1)
            adj_blk = jnp.where(col < k_left, adj_blk, jnp.zeros_like(adj_blk))
            row = lax.broadcasted_iota(jnp.int32, s_blk.shape, 0)
            s_blk = jnp.where(row < k_left, s_blk, jnp.zeros_like(s_blk))

        acc_ref[...] += jnp.dot(adj_blk, s_blk,
                                preferred_element_type=jnp.float32)

        @pl.when(k == pl.num_programs(1) - 1)
        def _():
            res = acc_ref[...]
            if has_bias:
                res = res + bias_ref[...]
            out_ref[...] = res.astype(out_ref.dtype)

    return kernel


def _make_fused_kernel(has_skip, has_bias, n_total, tile_k, mask_k):
    """K-tiled (F_out > F_in): accX += adj_k @ X_k; accS += adj_k @ S2_k;
    at last k: out = accX @ W (+ accS) (+ bias)."""

    def kernel(adj_ref, x_ref, w_ref, *rest):
        rest = list(rest)
        s2_ref = rest.pop(0) if has_skip else None
        bias_ref = rest.pop(0) if has_bias else None
        out_ref = rest.pop(0)
        acc_x_ref = rest.pop(0)
        acc_s_ref = rest.pop(0) if has_skip else None
        k = pl.program_id(1)

        @pl.when(k == 0)
        def _():
            acc_x_ref[...] = jnp.zeros_like(acc_x_ref)
            if has_skip:
                acc_s_ref[...] = jnp.zeros_like(acc_s_ref)

        adj_blk = adj_ref[...]
        x_blk = x_ref[...]
        s2_blk = s2_ref[...] if has_skip else None
        if mask_k:
            k_left = n_total - k * tile_k
            col = lax.broadcasted_iota(jnp.int32, adj_blk.shape, 1)
            adj_blk = jnp.where(col < k_left, adj_blk, jnp.zeros_like(adj_blk))
            rx = lax.broadcasted_iota(jnp.int32, x_blk.shape, 0)
            x_blk = jnp.where(rx < k_left, x_blk, jnp.zeros_like(x_blk))
            if has_skip:
                rs = lax.broadcasted_iota(jnp.int32, s2_blk.shape, 0)
                s2_blk = jnp.where(rs < k_left, s2_blk, jnp.zeros_like(s2_blk))

        acc_x_ref[...] += jnp.dot(adj_blk, x_blk,
                                  preferred_element_type=jnp.float32)
        if has_skip:
            acc_s_ref[...] += jnp.dot(adj_blk, s2_blk,
                                      preferred_element_type=jnp.float32)

        @pl.when(k == pl.num_programs(1) - 1)
        def _():
            res = jnp.dot(acc_x_ref[...], w_ref[...],
                          preferred_element_type=jnp.float32)
            if has_skip:
                res = res + acc_s_ref[...]
            if has_bias:
                res = res + bias_ref[...]
            out_ref[...] = res.astype(out_ref.dtype)

    return kernel


# ---------------------------------------------------------------------------
# Wrapper
# ---------------------------------------------------------------------------

def graph_convolution(inp, adj, origin_features, weight, weight2, bias=None,
                      *, need_skip=False, tile_n=None, tile_k=None):
    """Pallas TPU implementation of GraphConvolution.forward.

    output = adj @ (inp @ weight) [+ adj @ (origin_features @ weight2)] [+ bias]

    adj is streamed in the dtype it is stored in (never cast here).  For the
    ~2x bandwidth win, pre-cast adj to bfloat16 once and reuse across layers.
    """
    N, f_in = inp.shape
    f_out = weight.shape[1]
    has_bias = bias is not None
    assert adj.shape == (N, N)
    if need_skip:
        assert origin_features.shape == (N, weight2.shape[0])
        assert weight2.shape[1] == f_out, (
            "need_skip requires out_features == weight2.shape[1]")

    reassociate = f_out <= f_in            # shape-conditional contraction order
    stream_dtype = adj.dtype
    itemsz = jnp.dtype(stream_dtype).itemsize
    sub = 16 if itemsz == 2 else 8         # bf16 packs 16 rows per sublane tile

    # Generation-aware VMEM budget.
    capacity = _vmem_capacity_bytes()
    budget = capacity * 70 // 100          # for our blocks (compiler headroom)
    limit_cap = capacity * 82 // 100       # never request more than this

    bias2d = bias.reshape(1, f_out).astype(jnp.float32) if has_bias else None

    if reassociate:
        # Hoist the tiny GEMMs; kernel streams adj row x K tiles against S.
        s = jnp.dot(inp.astype(jnp.float32), weight.astype(jnp.float32),
                    preferred_element_type=jnp.float32)
        if need_skip:
            s = s + jnp.dot(origin_features.astype(jnp.float32),
                            weight2.astype(jnp.float32),
                            preferred_element_type=jnp.float32)
        s = s.astype(stream_dtype)

        def vmem_need(tn, tk):
            return (2 * _vmem_block_bytes((tn, tk), stream_dtype)       # adj
                    + 2 * _vmem_block_bytes((tk, f_out), stream_dtype)  # S
                    + (2 * _vmem_block_bytes((1, f_out), jnp.float32)
                       if has_bias else 0)
                    + 2 * _vmem_block_bytes((tn, f_out), jnp.float32)   # out
                    + _vmem_block_bytes((tn, f_out), jnp.float32))      # acc
    else:
        x_in = inp.astype(stream_dtype)
        w_in = weight.astype(jnp.float32)
        s2 = None
        if need_skip:
            s2 = jnp.dot(origin_features.astype(jnp.float32),
                         weight2.astype(jnp.float32),
                         preferred_element_type=jnp.float32).astype(stream_dtype)

        def vmem_need(tn, tk):
            need = (2 * _vmem_block_bytes((tn, tk), stream_dtype)       # adj
                    + 2 * _vmem_block_bytes((tk, f_in), stream_dtype)   # X
                    + 2 * _vmem_block_bytes((f_in, f_out), jnp.float32)  # W
                    + 2 * _vmem_block_bytes((tn, f_out), jnp.float32)   # out
                    + 2 * _vmem_block_bytes((tn, f_in), jnp.float32))   # acc + temp
            if need_skip:
                need += (2 * _vmem_block_bytes((tk, f_out), stream_dtype)
                         + _vmem_block_bytes((tn, f_out), jnp.float32))
            if has_bias:
                need += 2 * _vmem_block_bytes((1, f_out), jnp.float32)
            return need

    # Tile selection (explicit overrides are for testing).
    if tile_n is None and tile_k is None:
        tn, tk, need = _select_tiles(N, vmem_need, budget, sub)
    else:
        tn = N if (tile_n is None or tile_n >= N) else max(sub, (tile_n // sub) * sub)
        tk = N if (tile_k is None or tile_k >= N) else max(128, (tile_k // 128) * 128)
        need = vmem_need(tn, tk)

    rows, ksteps = pl.cdiv(N, tn), pl.cdiv(N, tk)
    mask_k = (tk < N) and (N % tk != 0)

    vmem_limit = int(min(max(need * 5 // 4 + (4 << 20), 32 << 20), limit_cap))
    vmem_limit = int(min(max(vmem_limit, need + (2 << 20)), capacity))

    if reassociate:
        operands = [adj, s]
        in_specs = [
            pl.BlockSpec((tn, tk), lambda i, k: (i, k)),      # adj row x K tile
            pl.BlockSpec((tk, f_out), lambda i, k: (k, 0)),   # S K tile
        ]
        if has_bias:
            operands.append(bias2d)
            in_specs.append(pl.BlockSpec((1, f_out), lambda i, k: (0, 0)))
        scratch_shapes = [pltpu.VMEM((tn, f_out), jnp.float32)]
        kernel = _make_adj_s_kernel(has_bias, N, tk, mask_k)

        flops = 2 * N * N * f_out
        bytes_accessed = (N * N * itemsz + rows * N * f_out * itemsz
                          + N * f_out * 4 + (f_out * 4 if has_bias else 0))
    else:
        operands = [adj, x_in, w_in]
        in_specs = [
            pl.BlockSpec((tn, tk), lambda i, k: (i, k)),
            pl.BlockSpec((tk, f_in), lambda i, k: (k, 0)),
            pl.BlockSpec((f_in, f_out), lambda i, k: (0, 0)),
        ]
        if need_skip:
            operands.append(s2)
            in_specs.append(pl.BlockSpec((tk, f_out), lambda i, k: (k, 0)))
        if has_bias:
            operands.append(bias2d)
            in_specs.append(pl.BlockSpec((1, f_out), lambda i, k: (0, 0)))
        scratch_shapes = [pltpu.VMEM((tn, f_in), jnp.float32)]
        if need_skip:
            scratch_shapes.append(pltpu.VMEM((tn, f_out), jnp.float32))
        kernel = _make_fused_kernel(need_skip, has_bias, N, tk, mask_k)

        flops = 2 * N * N * f_in + 2 * N * f_in * f_out
        if need_skip:
            flops += 2 * N * N * f_out
        bytes_accessed = (N * N * itemsz + rows * N * f_in * itemsz
                          + f_in * f_out * 4 + N * f_out * 4
                          + (rows * N * f_out * itemsz if need_skip else 0)
                          + (f_out * 4 if has_bias else 0))

    return pl.pallas_call(
        kernel,
        out_shape=jax.ShapeDtypeStruct((N, f_out), jnp.float32),
        grid_spec=pltpu.PrefetchScalarGridSpec(
            num_scalar_prefetch=0,
            grid=(rows, ksteps),                       # reduction axis last
            in_specs=in_specs,
            out_specs=pl.BlockSpec((tn, f_out), lambda i, k: (i, 0)),
            scratch_shapes=scratch_shapes),
        compiler_params=pltpu.CompilerParams(
            dimension_semantics=("parallel", "arbitrary"),
            vmem_limit_bytes=vmem_limit),
        cost_estimate=pl.CostEstimate(flops=flops, transcendentals=0,
                                      bytes_accessed=bytes_accessed),
    )(*operands)


# ---------------------------------------------------------------------------
# Reference + tests
# ---------------------------------------------------------------------------

def reference(inp, adj, origin_features, weight, weight2, bias, need_skip):
    adj32 = adj.astype(jnp.float32)
    out = adj32 @ (inp @ weight)
    if need_skip:
        out = out + adj32 @ (origin_features @ weight2)
    if bias is not None:
        out = out + bias
    return out


if __name__ == "__main__":
    ORIGIN_F = 332   # weight2 is hard-coded (332, 2) in the module

    def make_problem(key, n, f_in, f_out):
        k_in, k_adj, k_orig, k_w, k_w2, k_b = jax.random.split(key, 6)
        stdv = 1.0 / math.sqrt(f_out)                    # reset_parameters()
        w = jax.random.uniform(k_w, (f_in, f_out), jnp.float32, -stdv, stdv)
        w2 = jax.random.uniform(k_w2, (ORIGIN_F, 2), jnp.float32, -stdv, stdv)
        b = jax.random.uniform(k_b, (f_out,), jnp.float32, -stdv, stdv)
        x = jax.random.normal(k_in, (n, f_in), jnp.float32)
        origin = jax.random.normal(k_orig, (n, ORIGIN_F), jnp.float32)
        # TODO(synk): no sparse-matmul primitive in TPU Pallas; torch.spmm is
        # lowered to a dense MXU matmul on a materialized, row-normalized adj.
        a = (jax.random.uniform(k_adj, (n, n), jnp.float32) < 0.1).astype(jnp.float32)
        a = a + jnp.eye(n, dtype=jnp.float32)
        adj = a / jnp.sum(a, axis=1, keepdims=True)
        return x, adj, origin, w, w2, b

    root = jax.random.PRNGKey(0)
    k1, k2, k3 = jax.random.split(root, 3)

    # 1) Reassociated path (F_out <= F_in), skip + bias, f32, whole-tile grid.
    x, adj, origin, w, w2, b = make_problem(k1, 128, 64, 2)
    out = jax.block_until_ready(
        graph_convolution(x, adj, origin, w, w2, b, need_skip=True))
    ref = reference(x, adj, origin, w, w2, b, True)
    assert out.shape == (128, 2)
    assert jnp.allclose(out, ref, rtol=1e-4, atol=1e-4), "f32 reassoc mismatch"

    # 2) Non-divisible N with forced small tiles: exercises the K accumulator,
    #    the masked partial K tile, and the dropped partial output rows.
    xn, adjn, orign, wn, w2n, bn = make_problem(k2, 300, 64, 2)
    outn = jax.block_until_ready(
        graph_convolution(xn, adjn, orign, wn, w2n, bn, need_skip=True,
                          tile_n=128, tile_k=128))
    refn = reference(xn, adjn, orign, wn, w2n, bn, True)
    assert outn.shape == (300, 2)
    assert jnp.allclose(outn, refn, rtol=1e-4, atol=1e-4), "partial-tile mismatch"

    # 3) Fused path (F_out > F_in) with bias, K-tiled + masked.
    xf, adjf, originf, wf, w2f, bf = make_problem(k3, 300, 16, 64)
    outf = jax.block_until_ready(
        graph_convolution(xf, adjf, originf, wf, w2f, bf, need_skip=False,
                          tile_n=128, tile_k=128))
    reff = reference(xf, adjf, originf, wf, w2f, bf, False)
    assert outf.shape == (300, 64)
    assert jnp.allclose(outf, reff, rtol=1e-4, atol=1e-4), "fused path mismatch"

    # 4) bf16-streamed adj: adj is pre-cast ONCE outside the wrapper (reuse it
    #    across layers); deliberate precision tradeoff -> loose tolerance.
    adj_bf16 = adj.astype(jnp.bfloat16)
    out_bf16 = jax.block_until_ready(
        graph_convolution(x, adj_bf16, origin, w, w2, b, need_skip=True))
    assert jnp.allclose(out_bf16, ref, rtol=1e-1, atol=1e-1), "bf16 mismatch"

    print("KERNEL_OK")
</pallas_src>

<mosaic_0001>
module attributes {stable_mosaic.version = 11 : i64} {
  func.func @kernel(%arg0: i32, %arg1: i32, %arg2: memref<128x128xf32, #tpu.memory_space<vmem>>, %arg3: memref<128x2xf32, #tpu.memory_space<vmem>>, %arg4: memref<1x2xf32, #tpu.memory_space<vmem>>, %arg5: memref<128x2xf32, #tpu.memory_space<vmem>>, %arg6: memref<128x2xf32, #tpu.memory_space<vmem>>) attributes {dimension_semantics = [#tpu.dimension_semantics<parallel>, #tpu.dimension_semantics<arbitrary>], iteration_bounds = array<i64: 1, 1>, scalar_prefetch = 0 : i64, scratch_operands = 1 : i64, tpu.core_type = #tpu.core_type<tc>, window_params = [{transform_indices = @transform_0, window_bounds = array<i64: 128, 128>}, {transform_indices = @transform_1, window_bounds = array<i64: 128, 2>}, {pipeline_mode = #tpu.pipeline_mode<synchronous>, transform_indices = @transform_2, window_bounds = array<i64: 1, 2>}, {transform_indices = @transform_3, window_bounds = array<i64: 128, 2>}]} {
    %c0_i32 = arith.constant 0 : i32
    %0 = arith.cmpi eq, %arg1, %c0_i32 : i32
    %1 = arith.extui %0 : i1 to i32
    %c0_i32_0 = arith.constant 0 : i32
    %2 = arith.cmpi ne, %1, %c0_i32_0 : i32
    scf.if %2 {
      %cst_10 = arith.constant 0.000000e+00 : f32
      %12 = vector.broadcast %cst_10 : f32 to vector<128x2xf32>
      %c0_11 = arith.constant 0 : index
      %c0_12 = arith.constant 0 : index
      %13 = vector.load %arg6[%c0_11, %c0_12] : memref<128x2xf32, #tpu.memory_space<vmem>>, vector<128x2xf32>
      tpu.vector_store %arg6[%c0_11, %c0_12], %12 {strides = array<i32>} : memref<128x2xf32, #tpu.memory_space<vmem>>, vector<128x2xf32>,
    } else {
    }
    %c0 = arith.constant 0 : index
    %c0_1 = arith.constant 0 : index
    %3 = vector.load %arg2[%c0, %c0_1] : memref<128x128xf32, #tpu.memory_space<vmem>>, vector<128x128xf32>
    %c0_2 = arith.constant 0 : index
    %c0_3 = arith.constant 0 : index
    %4 = vector.load %arg3[%c0_2, %c0_3] : memref<128x2xf32, #tpu.memory_space<vmem>>, vector<128x2xf32>
    %c0_4 = arith.constant 0 : index
    %c0_5 = arith.constant 0 : index
    %5 = vector.load %arg6[%c0_4, %c0_5] : memref<128x2xf32, #tpu.memory_space<vmem>>, vector<128x2xf32>
    %cst = arith.constant dense<0.000000e+00> : vector<128x2xf32>
    %6 = tpu.matmul %3, %4, %cst {dimension_numbers = #tpu.dot_dimension_numbers<[1], [0], [0], [1], [0, 0, 1, 1], [], []>} : vector<128x128xf32>, vector<128x2xf32>, vector<128x2xf32> -> vector<128x2xf32>
    %7 = arith.addf %5, %6 : vector<128x2xf32>
    %c0_6 = arith.constant 0 : index
    %c0_7 = arith.constant 0 : index
    %8 = vector.load %arg6[%c0_6, %c0_7] : memref<128x2xf32, #tpu.memory_space<vmem>>, vector<128x2xf32>
    tpu.vector_store %arg6[%c0_6, %c0_7], %7 {strides = array<i32>} : memref<128x2xf32, #tpu.memory_space<vmem>>, vector<128x2xf32>,
    %c0_i32_8 = arith.constant 0 : i32
    %9 = arith.cmpi eq, %arg1, %c0_i32_8 : i32
    %10 = arith.extui %9 : i1 to i32
    %c0_i32_9 = arith.constant 0 : i32
    %11 = arith.cmpi ne, %10, %c0_i32_9 : i32
    scf.if %11 {
      %c0_10 = arith.constant 0 : index
      %c0_11 = arith.constant 0 : index
      %12 = vector.load %arg6[%c0_10, %c0_11] : memref<128x2xf32, #tpu.memory_space<vmem>>, vector<128x2xf32>
      %c0_12 = arith.constant 0 : index
      %c0_13 = arith.constant 0 : index
      %13 = vector.load %arg4[%c0_12, %c0_13] : memref<1x2xf32, #tpu.memory_space<vmem>>, vector<1x2xf32>
      %14 = vector.broadcast %13 : vector<1x2xf32> to vector<128x2xf32>
      %15 = arith.addf %12, %14 : vector<128x2xf32>
      %c0_14 = arith.constant 0 : index
      %c0_15 = arith.constant 0 : index
      %16 = vector.load %arg5[%c0_14, %c0_15] : memref<128x2xf32, #tpu.memory_space<vmem>>, vector<128x2xf32>
      tpu.vector_store %arg5[%c0_14, %c0_15], %15 {strides = array<i32>} : memref<128x2xf32, #tpu.memory_space<vmem>>, vector<128x2xf32>,
    } else {
    }
    return
  }
  func.func @transform_0(%arg0: i32, %arg1: i32) -> (i32, i32) {
    %c0_i32 = arith.constant 0 : i32
    return %arg0, %arg1 : i32, i32
  }
  func.func @transform_1(%arg0: i32, %arg1: i32) -> (i32, i32) {
    %c0_i32 = arith.constant 0 : i32
    %c0_i32_0 = arith.constant 0 : i32
    return %arg1, %c0_i32 : i32, i32
  }
  func.func @transform_2(%arg0: i32, %arg1: i32) -> (i32, i32) {
    %c0_i32 = arith.constant 0 : i32
    %c0_i32_0 = arith.constant 0 : i32
    %c0_i32_1 = arith.constant 0 : i32
    return %c0_i32, %c0_i32_0 : i32, i32
  }
  func.func @transform_3(%arg0: i32, %arg1: i32) -> (i32, i32) {
    %c0_i32 = arith.constant 0 : i32
    %c0_i32_0 = arith.constant 0 : i32
    return %arg0, %c0_i32 : i32, i32
  }
}

</mosaic_0001>

<bundles_post_ra>
// kernel: tpu_custom_call.1
= control target key start
LH: loop header
LB: loop body
LE: loop exit
PB: predicated region body
PF: predicated region fallthrough
CT: control target
= control target key end

     0   :  { %vm18_vm0 = vcmask 15360   ;;  %v290_v15 = vmov 0.0   ;;  %s524_s1 = inlined_call_operand.vmem [shape: f32[128,2], index: 1, kind: input, shape index: {}]   ;;  %s525_s2 = inlined_call_operand.vmem [shape: f32[1,2], index: 2, kind: input, shape index: {}]   ;;  %s526_s0 = inlined_call_operand.vmem [shape: f32[128,128], index: 0, kind: input, shape index: {}]   ;;  %s527_s3 = inlined_call_operand.vmem [shape: f32[128,2], index: 3, kind: output, shape index: {}]  }
   0x1   :  { %v66_v0 = vld [vmem:[%s524_s1 + $0x78] sm:$0xff]  ;;  %v65_v1 = vld [vmem:[%s524_s1 + $0x70] sm:$0xff]  ;;  %v64_v2 = vld [vmem:[%s524_s1 + $0x68] sm:$0xff]  ;;  %19 = vst.msk [vmem:[#allocation2] sm:$0xff] %vm18_vm0, %v290_v15 }
   0x2   :  { %241 = vmatpush.msra.mxu2 %v66_v0  ;;  %242 = vmatpush.msra.mxu3 %v66_v0  ;;  %v63_v3 = vld [vmem:[%s524_s1 + $0x60] sm:$0xff]  ;;  %v62_v4 = vld [vmem:[%s524_s1 + $0x58] sm:$0xff]  ;;  %v61_v5 = vld [vmem:[%s524_s1 + $0x50] sm:$0xff]  ;;  %20 = vst.msk [vmem:[#allocation2 + $0x8] sm:$0xff] %vm18_vm0, %v290_v15 }
   0x3   :  { %83 = vmatpush.msra.mxu0 %v66_v0  ;;  %240 = vmatpush.msra.mxu1 %v66_v0  ;;  %v60_v6 = vld [vmem:[%s524_s1 + $0x48] sm:$0xff]  ;;  %v59_v7 = vld [vmem:[%s524_s1 + $0x40] sm:$0xff]  ;;  %v58_v8 = vld [vmem:[%s524_s1 + $0x38] sm:$0xff]  ;;  %21 = vst.msk [vmem:[#allocation2 + $0x10] sm:$0xff] %vm18_vm0, %v290_v15 }
   0x4   :  { %244 = vmatpush.msra.mxu2 %v65_v1  ;;  %245 = vmatpush.msra.mxu3 %v65_v1  ;;  %v57_v9 = vld [vmem:[%s524_s1 + $0x30] sm:$0xff]  ;;  %v56_v10 = vld [vmem:[%s524_s1 + $0x28] sm:$0xff]  ;;  %v55_v11 = vld [vmem:[%s524_s1 + $0x20] sm:$0xff]  ;;  %22 = vst.msk [vmem:[#allocation2 + $0x18] sm:$0xff] %vm18_vm0, %v290_v15 }
   0x5   :  { %84 = vmatpush.msra.mxu0 %v65_v1  ;;  %243 = vmatpush.msra.mxu1 %v65_v1  ;;  %v54_v12 = vld [vmem:[%s524_s1 + $0x18] sm:$0xff]  ;;  %v53_v13 = vld [vmem:[%s524_s1 + $0x10] sm:$0xff]  ;;  %v52_v14 = vld [vmem:[%s524_s1 + $0x8] sm:$0xff]  ;;  %23 = vst.msk [vmem:[#allocation2 + $0x20] sm:$0xff] %vm18_vm0, %v290_v15 }
   0x6   :  { %247 = vmatpush.msra.mxu2 %v64_v2  ;;  %248 = vmatpush.msra.mxu3 %v64_v2  ;;  %v51_v16 = vld [vmem:[%s524_s1] sm:$0xff]  ;;  %24 = vst.msk [vmem:[#allocation2 + $0x28] sm:$0xff] %vm18_vm0, %v290_v15  ;;  %v44_v21 = vld [vmem:[%s526_s0 + $0x48] sm:$0xff]  ;;  %v45_v25 = vld [vmem:[%s526_s0 + $0x50] sm:$0xff] }
   0x7   :  { %85 = vmatpush.msra.mxu0 %v64_v2  ;;  %246 = vmatpush.msra.mxu1 %v64_v2  ;;  %v43_v17 = vld [vmem:[%s526_s0 + $0x40] sm:$0xff]  ;;  %25 = vst.msk [vmem:[#allocation2 + $0x30] sm:$0xff] %vm18_vm0, %v290_v15  ;;  %v48_v22 = vld [vmem:[%s526_s0 + $0x68] sm:$0xff]  ;;  %v49_v26 = vld [vmem:[%s526_s0 + $0x70] sm:$0xff] }
   0x8   :  { %250 = vmatpush.msra.mxu2 %v63_v3  ;;  %251 = vmatpush.msra.mxu3 %v63_v3  ;;  %v47_v18 = vld [vmem:[%s526_s0 + $0x60] sm:$0xff]  ;;  %26 = vst.msk [vmem:[#allocation2 + $0x38] sm:$0xff] %vm18_vm0, %v290_v15  ;;  %v36_v23 = vld [vmem:[%s526_s0 + $0x8] sm:$0xff]  ;;  %v37_v27 = vld [vmem:[%s526_s0 + $0x10] sm:$0xff] }
   0x9   :  { %86 = vmatpush.msra.mxu0 %v63_v3  ;;  %249 = vmatpush.msra.mxu1 %v63_v3  ;;  %v35_v19 = vld [vmem:[%s526_s0] sm:$0xff]  ;;  %27 = vst.msk [vmem:[#allocation2 + $0x40] sm:$0xff] %vm18_vm0, %v290_v15  ;;  %v40_v24 = vld [vmem:[%s526_s0 + $0x28] sm:$0xff]  ;;  %v41_v28 = vld [vmem:[%s526_s0 + $0x30] sm:$0xff] }
   0xa   :  { %253 = vmatpush.msra.mxu2 %v62_v4  ;;  %254 = vmatpush.msra.mxu3 %v62_v4  ;;  %v39_v20 = vld [vmem:[%s526_s0 + $0x20] sm:$0xff]  ;;  %28 = vst.msk [vmem:[#allocation2 + $0x48] sm:$0xff] %vm18_vm0, %v290_v15  ;;  %v46_v29 = vld [vmem:[%s526_s0 + $0x58] sm:$0xff]  ;;  %v68_v45 = vld [vmem:[#allocation2 + $0x8] sm:$0xff] }
   0xb   :  { %87 = vmatpush.msra.mxu0 %v62_v4  ;;  %252 = vmatpush.msra.mxu1 %v62_v4  ;;  %29 = vst.msk [vmem:[#allocation2 + $0x50] sm:$0xff] %vm18_vm0, %v290_v15  ;;  %v50_v30 = vld [vmem:[%s526_s0 + $0x78] sm:$0xff]  ;;  %v67_v33 = vld [vmem:[#allocation2] sm:$0xff]  ;;  %v69_v63 = vld [vmem:[#allocation2 + $0x10] sm:$0xff] }
   0xc   :  { %256 = vmatpush.msra.mxu2 %v61_v5  ;;  %257 = vmatpush.msra.mxu3 %v61_v5  ;;  %30 = vst.msk [vmem:[#allocation2 + $0x58] sm:$0xff] %vm18_vm0, %v290_v15  ;;  %v38_v31 = vld [vmem:[%s526_s0 + $0x18] sm:$0xff]  ;;  %v71_v34 = vld [vmem:[#allocation2 + $0x20] sm:$0xff] }
   0xd   :  { %88 = vmatpush.msra.mxu0 %v61_v5  ;;  %255 = vmatpush.msra.mxu1 %v61_v5  ;;  %31 = vst.msk [vmem:[#allocation2 + $0x60] sm:$0xff] %vm18_vm0, %v290_v15  ;;  %v42_v32 = vld [vmem:[%s526_s0 + $0x38] sm:$0xff]  ;;  %v72_v46 = vld [vmem:[#allocation2 + $0x28] sm:$0xff]  ;;  %v428_v47 = vld [vmem:[%s525_s2] ss:$0 sm:$0xff] }
   0xe   :  { %259 = vmatpush.msra.mxu2 %v60_v6  ;;  %260 = vmatpush.msra.mxu3 %v60_v6  ;;  %32 = vst.msk [vmem:[#allocation2 + $0x68] sm:$0xff] %vm18_vm0, %v290_v15  ;;  %v73_v0 = vld [vmem:[#allocation2 + $0x30] sm:$0xff] }
   0xf   :  { %89 = vmatpush.msra.mxu0 %v60_v6  ;;  %258 = vmatpush.msra.mxu1 %v60_v6  ;;  %33 = vst.msk [vmem:[#allocation2 + $0x70] sm:$0xff] %vm18_vm0, %v290_v15 }
  0x10   :  { %262 = vmatpush.msra.mxu2 %v59_v7  ;;  %263 = vmatpush.msra.mxu3 %v59_v7  ;;  %34 = vst.msk [vmem:[#allocation2 + $0x78] sm:$0xff] %vm18_vm0, %v290_v15  ;;  %v75_v39 = vld [vmem:[#allocation2 + $0x40] sm:$0xff] }
  0x11   :  { %90 = vmatpush.msra.mxu0 %v59_v7  ;;  %261 = vmatpush.msra.mxu1 %v59_v7  ;;  %v76_v53 = vld [vmem:[#allocation2 + $0x48] sm:$0xff] }
  0x12   :  { %265 = vmatpush.msra.mxu2 %v58_v8  ;;  %266 = vmatpush.msra.mxu3 %v58_v8 }
  0x13   :  { %91 = vmatpush.msra.mxu0 %v58_v8  ;;  %264 = vmatpush.msra.mxu1 %v58_v8 }
  0x14   :  { %268 = vmatpush.msra.mxu2 %v57_v9  ;;  %269 = vmatpush.msra.mxu3 %v57_v9  ;;  %v79_v40 = vld [vmem:[#allocation2 + $0x60] sm:$0xff] }
  0x15   :  { %92 = vmatpush.msra.mxu0 %v57_v9  ;;  %267 = vmatpush.msra.mxu1 %v57_v9  ;;  %v80_v54 = vld [vmem:[#allocation2 + $0x68] sm:$0xff]  ;;  %v77_v9 = vld [vmem:[#allocation2 + $0x50] sm:$0xff] }
  0x16   :  { %271 = vmatpush.msra.mxu2 %v56_v10  ;;  %272 = vmatpush.msra.mxu3 %v56_v10 }
  0x17   :  { %93 = vmatpush.msra.mxu0 %v56_v10  ;;  %270 = vmatpush.msra.mxu1 %v56_v10  ;;  %v81_v10 = vld [vmem:[#allocation2 + $0x70] sm:$0xff] }
  0x18   :  { %274 = vmatpush.msra.mxu2 %v55_v11  ;;  %275 = vmatpush.msra.mxu3 %v55_v11 }
  0x19   :  { %94 = vmatpush.msra.mxu0 %v55_v11  ;;  %273 = vmatpush.msra.mxu1 %v55_v11 }
  0x1a   :  { %277 = vmatpush.msra.mxu2 %v54_v12  ;;  %278 = vmatpush.msra.mxu3 %v54_v12 }
  0x1b   :  { %95 = vmatpush.msra.mxu0 %v54_v12  ;;  %276 = vmatpush.msra.mxu1 %v54_v12 }
  0x1c   :  { %280 = vmatpush.msra.mxu2 %v53_v13  ;;  %281 = vmatpush.msra.mxu3 %v53_v13 }
  0x1d   :  { %96 = vmatpush.msra.mxu0 %v53_v13  ;;  %279 = vmatpush.msra.mxu1 %v53_v13 }
  0x1e   :  { %283 = vmatpush.msra.mxu2 %v52_v14  ;;  %284 = vmatpush.msra.mxu3 %v52_v14 }
  0x1f   :  { %97 = vmatpush.msra.mxu0 %v52_v14  ;;  %282 = vmatpush.msra.mxu1 %v52_v14 }
  0x20   :  { %286 = vmatpush.msra.mxu2 %v51_v16  ;;  %287 = vmatpush.msra.mxu3 %v51_v16 }
  0x21   :  { %123 = vmatmul.f32.vlgmr.msra.gmra.mxu2 %v43_v17  ;;  %135 = vmatmul.f32.vlgmr.msra.gmra.mxu3 %v47_v18 }
  0x22   :  { %98 = vmatpush.msra.mxu0 %v51_v16  ;;  %285 = vmatpush.msra.mxu1 %v51_v16 }
  0x23   :  { %99 = vmatmul.f32.vlgmr.msra.gmra.mxu0 %v35_v19  ;;  %111 = vmatmul.f32.vlgmr.msra.gmra.mxu1 %v39_v20  ;;  %v70_v19 = vld [vmem:[#allocation2 + $0x18] sm:$0xff] }
  0x24   :  { %v74_v20 = vld [vmem:[#allocation2 + $0x38] sm:$0xff] }
  0x29   :  { %126 = vmatmul.f32.gmra.mxu2 %v44_v21  ;;  %138 = vmatmul.f32.gmra.mxu3 %v48_v22 }
  0x2b   :  { %102 = vmatmul.f32.gmra.mxu0 %v36_v23  ;;  %114 = vmatmul.f32.gmra.mxu1 %v40_v24 }
  0x31   :  { %129 = vmatmul.f32.gmra.mxu2 %v45_v25  ;;  %141 = vmatmul.f32.gmra.mxu3 %v49_v26 }
  0x33   :  { %105 = vmatmul.f32.gmra.mxu0 %v37_v27  ;;  %117 = vmatmul.f32.gmra.mxu1 %v41_v28 }
  0x39   :  { %132 = vmatmul.f32.gmra.mxu2 %v46_v29  ;;  %144 = vmatmul.f32.gmra.mxu3 %v50_v30  ;;  %v78_v29 = vld [vmem:[#allocation2 + $0x58] sm:$0xff] }
  0x3a   :  { %v82_v30 = vld [vmem:[#allocation2 + $0x78] sm:$0xff] }
  0x3b   :  { %108 = vmatmul.f32.gmra.mxu0 %v38_v31  ;;  %120 = vmatmul.f32.gmra.mxu1 %v42_v32 }
  0xa0   :  { %v100_v35 = vpop.f32.mrf.mxu0  ;;  %v112_v36 = vpop.f32.mrf.mxu1 }
  0xa1   :  { %v148_v37 = vadd.f32 %v100_v35, %v67_v33  ;;  %v152_v38 = vadd.f32 %v112_v36, %v71_v34 }
  0xa3   :  { %165 = vst.msk [vmem:[#allocation2] sm:$0xff] %vm18_vm0, %v148_v37 }
  0xa4   :  { %169 = vst.msk [vmem:[#allocation2 + $0x20] sm:$0xff] %vm18_vm0, %v152_v38  ;;  %v124_v41 = vpop.f32.mrf.mxu2  ;;  %v136_v42 = vpop.f32.mrf.mxu3 }
  0xa5   :  { %v156_v43 = vadd.f32 %v124_v41, %v75_v39  ;;  %v160_v44 = vadd.f32 %v136_v42, %v79_v40 }
  0xa7   :  { %173 = vst.msk [vmem:[#allocation2 + $0x40] sm:$0xff] %vm18_vm0, %v156_v43 }
  0xa8   :  { %177 = vst.msk [vmem:[#allocation2 + $0x60] sm:$0xff] %vm18_vm0, %v160_v44  ;;  %v103_v48 = vpop.f32.mrf.mxu0  ;;  %v115_v49 = vpop.f32.mrf.mxu1 }
  0xa9   :  { %v149_v50 = vadd.f32 %v103_v48, %v68_v45  ;;  %v153_v51 = vadd.f32 %v115_v49, %v72_v46 }
  0xaa   :  { %v184_v52 = vld [vmem:[#allocation2] sm:$0xff] }
  0xab   :  { %v204_v55 = vadd.f32 %v428_v47, %v184_v52  ;;  %v188_v56 = vld [vmem:[#allocation2 + $0x20] sm:$0xff]  ;;  %166 = vst.msk [vmem:[#allocation2 + $0x8] sm:$0xff] %vm18_vm0, %v149_v50 }
  0xac   :  { %v208_v57 = vadd.f32 %v428_v47, %v188_v56  ;;  %170 = vst.msk [vmem:[#allocation2 + $0x28] sm:$0xff] %vm18_vm0, %v153_v51  ;;  %v127_v58 = vpop.f32.mrf.mxu2  ;;  %v139_v59 = vpop.f32.mrf.mxu3 }
  0xad   :  { %220 = vst.msk [vmem:[%s527_s3] sm:$0xff] %vm18_vm0, %v204_v55  ;;  %v157_v60 = vadd.f32 %v127_v58, %v76_v53  ;;  %v161_v61 = vadd.f32 %v139_v59, %v80_v54 }
  0xae   :  { %224 = vst.msk [vmem:[%s527_s3 + $0x20] sm:$0xff] %vm18_vm0, %v208_v57  ;;  %v192_v62 = vld [vmem:[#allocation2 + $0x40] sm:$0xff] }
  0xaf   :  { %v212_v1 = vadd.f32 %v428_v47, %v192_v62  ;;  %v196_v2 = vld [vmem:[#allocation2 + $0x60] sm:$0xff]  ;;  %174 = vst.msk [vmem:[#allocation2 + $0x48] sm:$0xff] %vm18_vm0, %v157_v60 }
  0xb0   :  { %v216_v3 = vadd.f32 %v428_v47, %v196_v2  ;;  %178 = vst.msk [vmem:[#allocation2 + $0x68] sm:$0xff] %vm18_vm0, %v161_v61  ;;  %v106_v4 = vpop.f32.mrf.mxu0  ;;  %v118_v5 = vpop.f32.mrf.mxu1 }
  0xb1   :  { %228 = vst.msk [vmem:[%s527_s3 + $0x40] sm:$0xff] %vm18_vm0, %v212_v1  ;;  %v150_v6 = vadd.f32 %v106_v4, %v69_v63  ;;  %v154_v7 = vadd.f32 %v118_v5, %v73_v0 }
  0xb2   :  { %232 = vst.msk [vmem:[%s527_s3 + $0x60] sm:$0xff] %vm18_vm0, %v216_v3  ;;  %v185_v8 = vld [vmem:[#allocation2 + $0x8] sm:$0xff] }
  0xb3   :  { %v205_v11 = vadd.f32 %v428_v47, %v185_v8  ;;  %v189_v12 = vld [vmem:[#allocation2 + $0x28] sm:$0xff]  ;;  %167 = vst.msk [vmem:[#allocation2 + $0x10] sm:$0xff] %vm18_vm0, %v150_v6 }
  0xb4   :  { %v209_v13 = vadd.f32 %v428_v47, %v189_v12  ;;  %171 = vst.msk [vmem:[#allocation2 + $0x30] sm:$0xff] %vm18_vm0, %v154_v7  ;;  %v130_v14 = vpop.f32.mrf.mxu2  ;;  %v142_v15 = vpop.f32.mrf.mxu3 }
  0xb5   :  { %221 = vst.msk [vmem:[%s527_s3 + $0x8] sm:$0xff] %vm18_vm0, %v205_v11  ;;  %v158_v16 = vadd.f32 %v130_v14, %v77_v9  ;;  %v162_v17 = vadd.f32 %v142_v15, %v81_v10 }
  0xb6   :  { %225 = vst.msk [vmem:[%s527_s3 + $0x28] sm:$0xff] %vm18_vm0, %v209_v13  ;;  %v193_v18 = vld [vmem:[#allocation2 + $0x48] sm:$0xff] }
  0xb7   :  { %v213_v21 = vadd.f32 %v428_v47, %v193_v18  ;;  %v197_v22 = vld [vmem:[#allocation2 + $0x68] sm:$0xff]  ;;  %175 = vst.msk [vmem:[#allocation2 + $0x50] sm:$0xff] %vm18_vm0, %v158_v16 }
  0xb8   :  { %v217_v23 = vadd.f32 %v428_v47, %v197_v22  ;;  %179 = vst.msk [vmem:[#allocation2 + $0x70] sm:$0xff] %vm18_vm0, %v162_v17  ;;  %v109_v24 = vpop.f32.mrf.mxu0  ;;  %v121_v25 = vpop.f32.mrf.mxu1 }
  0xb9   :  { %229 = vst.msk [vmem:[%s527_s3 + $0x48] sm:$0xff] %vm18_vm0, %v213_v21  ;;  %v151_v26 = vadd.f32 %v109_v24, %v70_v19  ;;  %v155_v27 = vadd.f32 %v121_v25, %v74_v20 }
  0xba   :  { %233 = vst.msk [vmem:[%s527_s3 + $0x68] sm:$0xff] %vm18_vm0, %v217_v23  ;;  %v186_v28 = vld [vmem:[#allocation2 + $0x10] sm:$0xff] }
  0xbb   :  { %v206_v31 = vadd.f32 %v428_v47, %v186_v28  ;;  %v190_v32 = vld [vmem:[#allocation2 + $0x30] sm:$0xff]  ;;  %168 = vst.msk [vmem:[#allocation2 + $0x18] sm:$0xff] %vm18_vm0, %v151_v26 }
  0xbc   :  { %v210_v33 = vadd.f32 %v428_v47, %v190_v32  ;;  %172 = vst.msk [vmem:[#allocation2 + $0x38] sm:$0xff] %vm18_vm0, %v155_v27  ;;  %v133_v34 = vpop.f32.mrf.mxu2  ;;  %v145_v35 = vpop.f32.mrf.mxu3 }
  0xbd   :  { %222 = vst.msk [vmem:[%s527_s3 + $0x10] sm:$0xff] %vm18_vm0, %v206_v31  ;;  %v159_v36 = vadd.f32 %v133_v34, %v78_v29  ;;  %v163_v37 = vadd.f32 %v145_v35, %v82_v30 }
  0xbe   :  { %226 = vst.msk [vmem:[%s527_s3 + $0x30] sm:$0xff] %vm18_vm0, %v210_v33  ;;  %v194_v38 = vld [vmem:[#allocation2 + $0x50] sm:$0xff] }
  0xbf   :  { %v214_v39 = vadd.f32 %v428_v47, %v194_v38  ;;  %v198_v40 = vld [vmem:[#allocation2 + $0x70] sm:$0xff]  ;;  %176 = vst.msk [vmem:[#allocation2 + $0x58] sm:$0xff] %vm18_vm0, %v159_v36 }
  0xc0   :  { %v218_v41 = vadd.f32 %v428_v47, %v198_v40  ;;  %180 = vst.msk [vmem:[#allocation2 + $0x78] sm:$0xff] %vm18_vm0, %v163_v37 }
  0xc1   :  { %230 = vst.msk [vmem:[%s527_s3 + $0x50] sm:$0xff] %vm18_vm0, %v214_v39 }
  0xc2   :  { %234 = vst.msk [vmem:[%s527_s3 + $0x70] sm:$0xff] %vm18_vm0, %v218_v41  ;;  %v187_v42 = vld [vmem:[#allocation2 + $0x18] sm:$0xff] }
  0xc3   :  { %v207_v43 = vadd.f32 %v428_v47, %v187_v42  ;;  %v191_v44 = vld [vmem:[#allocation2 + $0x38] sm:$0xff] }
  0xc4   :  { %v211_v45 = vadd.f32 %v428_v47, %v191_v44 }
  0xc5   :  { %223 = vst.msk [vmem:[%s527_s3 + $0x18] sm:$0xff] %vm18_vm0, %v207_v43 }
  0xc6   :  { %227 = vst.msk [vmem:[%s527_s3 + $0x38] sm:$0xff] %vm18_vm0, %v211_v45  ;;  %v195_v46 = vld [vmem:[#allocation2 + $0x58] sm:$0xff] }
  0xc7   :  { %v215_v48 = vadd.f32 %v428_v47, %v195_v46  ;;  %v199_v49 = vld [vmem:[#allocation2 + $0x78] sm:$0xff] }
  0xc8   :  { %v219_v50 = vadd.f32 %v428_v47, %v199_v49 }
  0xc9   :  { %231 = vst.msk [vmem:[%s527_s3 + $0x58] sm:$0xff] %vm18_vm0, %v215_v48 }
  0xca   :  { %235 = vst.msk [vmem:[%s527_s3 + $0x78] sm:$0xff] %vm18_vm0, %v219_v50 }

</bundles_post_ra>
